<compile_context>
chip_gen: v6e
topology: v6e:2x2x1
jax: 0.10.0
libtpu: 0.0.40
codegen_flags: <defaults>
</compile_context>

<pallas_src>
import jax
import jax.numpy as jnp
from jax.experimental import pallas as pl
from jax.experimental.pallas import tpu as pltpu


# ---------------------------------------------------------------------------
# Kernels
# ---------------------------------------------------------------------------
def _projection_kernel_fused(x_ref, w_ref, b_ref, o_ref):
    # x_ref: (tm, D)   w_ref: (D, tn)   b_ref: (1, tn) f32   o_ref: (tm, tn)
    acc = jnp.dot(x_ref[...], w_ref[...], preferred_element_type=jnp.float32)
    o_ref[...] = (acc + b_ref[...]).astype(o_ref.dtype)


def _projection_kernel_acc(x_ref, w_ref, b_ref, o_ref, acc_ref):
    # x_ref: (tm, tk)  w_ref: (tk, tn)  b_ref: (1, tn) f32
    # o_ref: (tm, tn)  acc_ref: (tm, tn) f32 scratch, resident across K axis
    k = pl.program_id(2)

    @pl.when(k == 0)
    def _():
        acc_ref[...] = jnp.zeros_like(acc_ref)

    acc_ref[...] += jnp.dot(x_ref[...], w_ref[...],
                            preferred_element_type=jnp.float32)

    @pl.when(k == pl.num_programs(2) - 1)
    def _():
        o_ref[...] = (acc_ref[...] + b_ref[...]).astype(o_ref.dtype)


# ---------------------------------------------------------------------------
# Tile selection (generation-aware)
# ---------------------------------------------------------------------------
def _round_up(x, m):
    return ((x + m - 1) // m) * m


def _vmem_budget():
    try:
        cap = pltpu.get_tpu_info().vmem_capacity_bytes
    except Exception:  # pragma: no cover - conservative fallback
        cap = 64 * 1024 * 1024
    # Leave headroom: ~75% of physical VMEM, never more than 100 MiB.
    return cap, min(int(cap * 3 // 4), 100 * 1024 * 1024)


def _target_tiles(vmem_cap, compute_itemsize):
    if vmem_cap <= 64 * 1024 * 1024:
        # v7x-class: only 64 MiB VMEM per TC, but ~3.2 TB/s HBM -> smaller
        # tiles already reach the compute roofline; don't blow the budget.
        return 512, 1024, 512
    # v5e / v6e class (128 MiB VMEM).
    if compute_itemsize <= 2:
        return 1024, 1024, 1024  # bf16: push toward the 918 TF/s roofline
    return 1024, 1024, 512


def _fits(tm, tn, tk, use_k, in_item, out_item, budget):
    x_b = 2 * tm * tk * in_item          # double-buffered input tile
    w_b = 2 * tk * tn * in_item          # double-buffered weight tile
    b_b = 2 * 8 * tn * 4                 # (1, tn) f32 bias, sublane-padded to 8
    o_b = 2 * tm * tn * out_item         # double-buffered output tile
    acc = tm * tn * 4 if use_k else 0    # region-0 f32 accumulator scratch
    return x_b + w_b + b_b + o_b + acc <= budget


def _select_tiles(M, D, V, in_item, out_item, budget, vmem_cap):
    tm_t, tn_t, tk_t = _target_tiles(vmem_cap, in_item)
    tm = min(tm_t, _round_up(M, 8))
    tn = min(tn_t, _round_up(V, 128))

    # Prefer collapsing the reduction axis: full-D tiles, no acc scratch.
    if _fits(tm, tn, D, False, in_item, out_item, budget):
        return tm, tn, D, False

    tk = min(tk_t, _round_up(D, 128))
    while not _fits(tm, tn, tk, True, in_item, out_item, budget):
        if tm >= tn and tm >= tk and tm > 8:
            tm = max(8, _round_up(tm // 2, 8))
        elif tn >= tk and tn > 128:
            tn = max(128, _round_up(tn // 2, 128))
        elif tk > 128:
            tk = max(128, _round_up(tk // 2, 128))
        else:
            break
    return tm, tn, tk, True


# ---------------------------------------------------------------------------
# Wrapper
# ---------------------------------------------------------------------------
def projection_layer(x, weight, bias, *, compute_dtype=None,
                     tm=None, tn=None, tk=None):
    """x: (B, S, d_model); weight: (vocab, d_model); bias: (vocab,).

    compute_dtype: optional reduced-precision operand dtype (e.g. jnp.bfloat16)
    for the matmul operands; accumulation and bias add stay in f32 and the
    output is cast back to x.dtype.
    """
    B, S, D = x.shape
    V, D_w = weight.shape
    assert D == D_w
    M = B * S
    out_dtype = x.dtype
    cdt = jnp.dtype(compute_dtype) if compute_dtype is not None else jnp.dtype(x.dtype)
    in_item = cdt.itemsize
    out_item = jnp.dtype(out_dtype).itemsize

    vmem_cap, budget = _vmem_budget()
    sel_tm, sel_tn, sel_tk, _ = _select_tiles(M, D, V, in_item, out_item,
                                              budget, vmem_cap)
    tm = tm if tm is not None else sel_tm
    tn = tn if tn is not None else sel_tn
    tk = tk if tk is not None else sel_tk
    if tk >= D:
        tk, use_k = D, False
    else:
        use_k = True

    M_pad = _round_up(M, tm)
    V_pad = _round_up(V, tn)
    D_pad = _round_up(D, tk) if use_k else D

    # Pad / cast inputs in the wrapper (constant-folded / fused under jit).
    x2d = x.reshape(M, D).astype(cdt)
    if (M_pad, D_pad) != (M, D):
        x2d = jnp.pad(x2d, ((0, M_pad - M), (0, D_pad - D)))

    # One-time transpose to (D, V): canonical (M,K)x(K,N) MXU feed in-kernel.
    wT = weight.astype(cdt).T
    if (D_pad, V_pad) != (D, V):
        wT = jnp.pad(wT, ((0, D_pad - D), (0, V_pad - V)))

    b2d = bias.astype(jnp.float32).reshape(1, V)
    if V_pad != V:
        b2d = jnp.pad(b2d, ((0, 0), (0, V_pad - V)))

    n_i, n_j = M_pad // tm, V_pad // tn

    # Real streamed traffic: weight re-read n_i times, x re-read n_j times.
    cost = pl.CostEstimate(
        flops=2 * M_pad * D_pad * V_pad,
        transcendentals=0,
        bytes_accessed=(M_pad * D_pad * in_item * n_j
                        + D_pad * V_pad * in_item * n_i
                        + V_pad * 4 * n_i
                        + M_pad * V_pad * out_item),
    )

    if use_k:
        grid_spec = pltpu.PrefetchScalarGridSpec(
            num_scalar_prefetch=0,
            grid=(n_i, n_j, D_pad // tk),
            in_specs=[
                pl.BlockSpec((tm, tk), lambda i, j, k: (i, k)),   # x rows
                pl.BlockSpec((tk, tn), lambda i, j, k: (k, j)),   # (D, V) weight
                pl.BlockSpec((1, tn), lambda i, j, k: (0, j)),    # bias
            ],
            out_specs=pl.BlockSpec((tm, tn), lambda i, j, k: (i, j)),
            scratch_shapes=[pltpu.VMEM((tm, tn), jnp.float32)],
        )
        kernel = _projection_kernel_acc
        semantics = ("parallel", "parallel", "arbitrary")
    else:
        grid_spec = pltpu.PrefetchScalarGridSpec(
            num_scalar_prefetch=0,
            grid=(n_i, n_j),
            in_specs=[
                pl.BlockSpec((tm, D_pad), lambda i, j: (i, 0)),
                pl.BlockSpec((D_pad, tn), lambda i, j: (0, j)),
                pl.BlockSpec((1, tn), lambda i, j: (0, j)),
            ],
            out_specs=pl.BlockSpec((tm, tn), lambda i, j: (i, j)),
            scratch_shapes=[],
        )
        kernel = _projection_kernel_fused
        semantics = ("parallel", "parallel")

    out = pl.pallas_call(
        kernel,
        out_shape=jax.ShapeDtypeStruct((M_pad, V_pad), out_dtype),
        grid_spec=grid_spec,
        compiler_params=pltpu.CompilerParams(
            dimension_semantics=semantics,
            vmem_limit_bytes=budget,
        ),
        cost_estimate=cost,
    )(x2d, wT, b2d)

    return out[:M, :V].reshape(B, S, V)


# ---------------------------------------------------------------------------
# Self-test
# ---------------------------------------------------------------------------
if __name__ == "__main__":
    batch, seq, d_model, vocab_size = 2, 8, 32, 64

    key = jax.random.PRNGKey(0)
    kx, kw, kb = jax.random.split(key, 3)

    x = jax.random.normal(kx, (batch, seq, d_model), dtype=jnp.float32)
    # Deterministic init mimicking nn.Linear's uniform(-1/sqrt(d), 1/sqrt(d)).
    bound = 1.0 / (d_model ** 0.5)
    weight = jax.random.uniform(kw, (vocab_size, d_model), jnp.float32, -bound, bound)
    bias = jax.random.uniform(kb, (vocab_size,), jnp.float32, -bound, bound)

    ref = x @ weight.T + bias

    # Exact-precision path (matches nn.Linear f32 numerics).
    out = jax.block_until_ready(projection_layer(x, weight, bias))
    assert out.shape == (batch, seq, vocab_size)
    assert jnp.allclose(out, ref, atol=1e-5, rtol=1e-5)

    # Reduced-precision operand fast path (bf16 x/w, f32 accumulate + bias).
    out_bf16 = jax.block_until_ready(
        projection_layer(x, weight, bias, compute_dtype=jnp.bfloat16))
    assert out_bf16.shape == (batch, seq, vocab_size)
    assert jnp.allclose(out_bf16, ref, atol=3e-2, rtol=3e-2)

    print("KERNEL_OK")
</pallas_src>

<mosaic_0001>
module attributes {stable_mosaic.version = 11 : i64} {
  func.func @_projection_kernel_fused(%arg0: i32, %arg1: i32, %arg2: memref<16x32xf32, #tpu.memory_space<vmem>>, %arg3: memref<32x128xf32, #tpu.memory_space<vmem>>, %arg4: memref<1x128xf32, #tpu.memory_space<vmem>>, %arg5: memref<16x128xf32, #tpu.memory_space<vmem>>) attributes {dimension_semantics = [#tpu.dimension_semantics<parallel>, #tpu.dimension_semantics<parallel>], iteration_bounds = array<i64: 1, 1>, scalar_prefetch = 0 : i64, scratch_operands = 0 : i64, tpu.core_type = #tpu.core_type<tc>, window_params = [{transform_indices = @transform_0, window_bounds = array<i64: 16, 32>}, {transform_indices = @transform_1, window_bounds = array<i64: 32, 128>}, {transform_indices = @transform_2, window_bounds = array<i64: 1, 128>}, {transform_indices = @transform_3, window_bounds = array<i64: 16, 128>}]} {
    %c0 = arith.constant 0 : index
    %c0_0 = arith.constant 0 : index
    %0 = vector.load %arg2[%c0, %c0_0] : memref<16x32xf32, #tpu.memory_space<vmem>>, vector<16x32xf32>
    %c0_1 = arith.constant 0 : index
    %c0_2 = arith.constant 0 : index
    %1 = vector.load %arg3[%c0_1, %c0_2] : memref<32x128xf32, #tpu.memory_space<vmem>>, vector<32x128xf32>
    %cst = arith.constant dense<0.000000e+00> : vector<16x128xf32>
    %2 = tpu.matmul %0, %1, %cst {dimension_numbers = #tpu.dot_dimension_numbers<[1], [0], [0], [1], [0, 0, 1, 1], [], []>} : vector<16x32xf32>, vector<32x128xf32>, vector<16x128xf32> -> vector<16x128xf32>
    %c0_3 = arith.constant 0 : index
    %c0_4 = arith.constant 0 : index
    %3 = vector.load %arg4[%c0_3, %c0_4] : memref<1x128xf32, #tpu.memory_space<vmem>>, vector<1x128xf32>
    %4 = vector.broadcast %3 : vector<1x128xf32> to vector<16x128xf32>
    %5 = arith.addf %2, %4 : vector<16x128xf32>
    %c0_5 = arith.constant 0 : index
    %c0_6 = arith.constant 0 : index
    %6 = vector.load %arg5[%c0_5, %c0_6] : memref<16x128xf32, #tpu.memory_space<vmem>>, vector<16x128xf32>
    tpu.vector_store %arg5[%c0_5, %c0_6], %5 {strides = array<i32>} : memref<16x128xf32, #tpu.memory_space<vmem>>, vector<16x128xf32>,
    return
  }
  func.func @transform_0(%arg0: i32, %arg1: i32) -> (i32, i32) {
    %c0_i32 = arith.constant 0 : i32
    %c0_i32_0 = arith.constant 0 : i32
    return %arg0, %c0_i32 : i32, i32
  }
  func.func @transform_1(%arg0: i32, %arg1: i32) -> (i32, i32) {
    %c0_i32 = arith.constant 0 : i32
    %c0_i32_0 = arith.constant 0 : i32
    return %c0_i32, %arg1 : i32, i32
  }
  func.func @transform_2(%arg0: i32, %arg1: i32) -> (i32, i32) {
    %c0_i32 = arith.constant 0 : i32
    %c0_i32_0 = arith.constant 0 : i32
    return %c0_i32, %arg1 : i32, i32
  }
  func.func @transform_3(%arg0: i32, %arg1: i32) -> (i32, i32) {
    %c0_i32 = arith.constant 0 : i32
    return %arg0, %arg1 : i32, i32
  }
}

</mosaic_0001>

<bundles_post_ra>
// kernel: tpu_custom_call.1
= control target key start
LH: loop header
LB: loop body
LE: loop exit
PB: predicated region body
PF: predicated region fallthrough
CT: control target
= control target key end

     0   :  { %8 = vsyncpa [#allocation3], 0  ;;  %s297_s0 = inlined_call_operand.hbm [shape: f32[16,32], index: 0, kind: input, shape index: {}]   ;;  %s298_s1 = inlined_call_operand.hbm [shape: f32[32,128], index: 1, kind: input, shape index: {}]   ;;  %s299_s2 = inlined_call_operand.vmem [shape: f32[1,128], index: 2, kind: input, shape index: {}]   ;;  %s300_s3 = inlined_call_operand.hbm [shape: f32[16,128], index: 3, kind: output, shape index: {}]  }
   0x1   :  { %9 = vsyncpa [#allocation6], 0 }
   0x2   :  { %10 = vsyncpa [#allocation4], 0  ;;  %s249_s12 = smov [#allocation2]  }
   0x3   :  { %s16_s13 = sshll.u32 %s249_s12, 4  ;;  %s17_s13 = int_to_ptr.vmem [resolvable:$true] %s16_s13 }
   0x4   :  { %s191_s14 = scalar_lea.vmem %s17_s13, 256  ;;  %p196_p1 = scmp.lt.s32.totalorder %s17_s13, %s17_s13 }
   0x5   :  { %p192_p0 = scmp.ne.s32.totalorder %s17_s13, %s191_s14  ;;  %p197_p2 = scmp.lt.s32.totalorder %s191_s14, %s191_s14 }
   0x7   :  { %p198_p3 = por %p197_p2, %p196_p1 }
   0x9   :  { %p199_p4 = pnand %p198_p3, %p192_p0 }
   0xb   :  { %202 = shalt.err (!%p199_p4)
}
   0xc   :  { %s250_s15 = smov 128   ;;  %s251_s16 = smov 8  }
   0xd   :  { %22 = dma.hbm_to_vmem [thread:$0]  %s297_s0, 256, %s17_s13, [#allocation3], %s250_s15, %s250_s15, %s251_s16  }
   0xe   :  { %s252_s19 = smov [#allocation5]  }
   0xf   :  { %s28_s20 = sshll.u32 %s252_s19, 4  ;;  %s29_s20 = int_to_ptr.vmem [resolvable:$true] %s28_s20 }
  0x10   :  { %s211_s21 = scalar_lea.vmem %s29_s20, 512  ;;  %p216_p6 = scmp.lt.s32.totalorder %s29_s20, %s29_s20 }
  0x11   :  { %p212_p5 = scmp.ne.s32.totalorder %s29_s20, %s211_s21  ;;  %p217_p7 = scmp.lt.s32.totalorder %s211_s21, %s211_s21 }
  0x13   :  { %p218_p8 = por %p217_p7, %p216_p6 }
  0x15   :  { %p219_p9 = pnand %p218_p8, %p212_p5 }
  0x17   :  { %222 = shalt.err (!%p219_p9)
}
  0x18   :  { %34 = dma.hbm_to_vmem [thread:$0]  %s298_s1, 512, %s29_s20, [#allocation6], %s250_s15, %s250_s15, %s251_s16  }
  0x19   :  { %243 = dma.done.wait [#allocation3], 256  }
  0x1a   :  { %244 = vsyncadd [#allocation3], 4294967040 }
  0x1b   :  { %245 = dma.done.wait [#allocation6], 512  }
  0x1c   :  { %246 = vsyncadd [#allocation6], 4294966784  ;;  %vm56_vm0 = vcmask 261120   ;;  %v48_v0 = vld [vmem:[#allocation5 + $0x18] sm:$0xff]  ;;  %v47_v1 = vld [vmem:[#allocation5 + $0x10] sm:$0xff]  ;;  %s253_s24 = smov [#allocation7]  }
  0x1d   :  { %167 = vmatprep.subr.mxu0 %v48_v0  ;;  %v43_v2 = vld [vmem:[#allocation2] sm:$0xff]  ;;  %v46_v3 = vld [vmem:[#allocation5 + $0x8] sm:$0xff]  ;;  %v45_v4 = vld [vmem:[#allocation5] sm:$0xff]  ;;  %s145_s25 = sshll.u32 %s253_s24, 4  ;;  %s146_s25 = int_to_ptr.vmem [resolvable:$true] %s145_s25 }
  0x1e   :  { %168 = vmatpush3.msra.mxu0 %v48_v0  ;;  %175 = vmatprep.mubr.msk.f32.mxu0 %vm56_vm0, %v43_v2  ;;  %v44_v5 = vld [vmem:[#allocation2 + $0x8] sm:$0xff]  ;;  %v158_v6 = vld [vmem:[%s299_s2] ss:$0 sm:$0xff]  ;;  %s223_s26 = scalar_lea.vmem %s146_s25, 256  ;;  %p228_p11 = scmp.lt.s32.totalorder %s146_s25, %s146_s25 }
  0x1f   :  { %169 = vmatprep.subr.mxu0 %v47_v1  ;;  %p224_p10 = scmp.ne.s32.totalorder %s146_s25, %s223_s26  ;;  %p229_p12 = scmp.lt.s32.totalorder %s223_s26, %s223_s26 }
  0x20   :  { %170 = vmatpush3.msra.mxu0 %v47_v1 }
  0x21   :  { %171 = vmatprep.subr.mxu0 %v46_v3  ;;  %p230_p13 = por %p229_p12, %p228_p11 }
  0x22   :  { %172 = vmatpush3.msra.mxu0 %v46_v3 }
  0x23   :  { %173 = vmatprep.subr.mxu0 %v45_v4  ;;  %p231_p0 = pnand %p230_p13, %p224_p10 }
  0x24   :  { %174 = vmatpush3.msra.mxu0 %v45_v4 }
  0x25   :  { %176 = vmatmul.mubr.msk.f32.vlgmr.msra.gmra.mxu0 %vm56_vm0, %v44_v5 }
  0xe5   :  { %v177_v7 = vpop.f32.mrf.mxu0 }
  0xe6   :  { %v135_v8 = vadd.f32 %v177_v7, %v158_v6 }
  0xe7   :  { %v129_v9 = vpop.f32.mrf.mxu0 }
  0xe8   :  { %139 = vst [vmem:[#allocation7 + $0x8] sm:$0xff] %v135_v8  ;;  %v130_v10 = vadd.f32 %v158_v6, %v129_v9 }
  0xea   :  { %138 = vst [vmem:[#allocation7] sm:$0xff] %v130_v10 }
  0xeb   :  { %234 = shalt.err (!%p231_p0)
}
  0xec   :  { %151 = dma.vmem_to_hbm [thread:$0]  %s146_s25, 256, %s300_s3, [#allocation4], %s250_s15, %s250_s15, %s251_s16  }
  0xed   :  { %247 = dma.done.wait [#allocation4], 256  }
  0xee   :  { %248 = vsyncadd [#allocation4], 4294967040 }
  0xef   :  { %155 = vsyncpa [#allocation3], 1 }
  0xf0   :  { %156 = vsyncpa [#allocation6], 1 }
  0xf1   :  { %157 = vsyncpa [#allocation4], 1 }

</bundles_post_ra>
